<compile_context>
chip_gen: v5e
topology: v5e:2x2
jax: 0.10.0
libtpu: 0.0.40
codegen_flags: <defaults>
</compile_context>

<pallas_src>
import functools
import math

import jax
import jax.numpy as jnp
from jax import lax
from jax.experimental import pallas as pl
from jax.experimental.pallas import tpu as pltpu


# ---------------------------------------------------------------------------
# Kernels
# ---------------------------------------------------------------------------
def _channel_gate(pooled, w_ref, k, pad):
    """Conv1d(1,1,k) across channels + sigmoid on a (Nb, C) pooled tensor.

    Implemented as k shifted adds (pltpu.roll along the lane axis + edge masks
    for the zero padding) instead of a (C, C) matvec — stays on XLU/VPU/EUP.
    """
    nb, c = pooled.shape
    cidx = lax.broadcasted_iota(jnp.int32, (nb, c), 1)
    att = jnp.zeros_like(pooled)
    for j in range(k):
        off = j - pad                       # att[:, i] += w[j] * pooled[:, i + off]
        shift = (-off) % c
        src = pltpu.roll(pooled, shift=shift, axis=1) if shift else pooled
        if off != 0:
            valid = (cidx + off >= 0) & (cidx + off < c)
            src = jnp.where(valid, src, 0.0)
        att = att + w_ref[j] * src
    return jax.nn.sigmoid(att)


def _fused_kernel(w_ref, x_ref, o_ref, *, k, pad, inv_hw):
    """Fused pool -> channel-conv -> sigmoid -> gate for one batch block.

    w_ref : (k,)           f32, SMEM  -- Conv1d(1,1,k) weights
    x_ref : (Nb, C, HW)    input block (channels on sublanes, spatial on lanes)
    o_ref : (Nb, C, HW)    gated output block
    """
    x = x_ref[...].astype(jnp.float32)                     # (Nb, C, HW)
    pooled = jnp.sum(x, axis=2) * inv_hw                   # (Nb, C)  global mean
    gate = _channel_gate(pooled, w_ref, k, pad)            # (Nb, C)
    o_ref[...] = (x * gate[:, :, None]).astype(o_ref.dtype)


def _pool_kernel(x_ref, sum_ref, *, inv_hw):
    """Fallback pass 1: per-(batch, channel) spatial mean, tiled over HW."""
    h = pl.program_id(1)

    @pl.when(h == 0)
    def _():
        sum_ref[...] = jnp.zeros_like(sum_ref)

    sum_ref[...] = sum_ref[...] + jnp.sum(
        x_ref[...].astype(jnp.float32), axis=2, keepdims=True)

    @pl.when(h == pl.num_programs(1) - 1)
    def _():
        sum_ref[...] = sum_ref[...] * inv_hw


def _gate_mul_kernel(g_ref, x_ref, o_ref):
    """Fallback pass 2: per-channel gating of one (1, C, hw_tile) block."""
    o_ref[...] = (x_ref[...].astype(jnp.float32) * g_ref[...]).astype(o_ref.dtype)


# ---------------------------------------------------------------------------
# Host-side helpers
# ---------------------------------------------------------------------------
def _vmem_capacity_bytes():
    try:
        cap = getattr(pltpu.get_tpu_info(), "vmem_capacity_bytes", None)
        if cap:
            return int(cap)
    except Exception:
        pass
    return 64 * 1024 * 1024          # conservative default (v7x per-core VMEM)


def _round_up(x, m):
    return (x + m - 1) // m * m


def _pick_batch_block(n, elem_io_bytes, elem_f32_bytes, budget):
    """Largest divisor Nb of n whose fused block fits `budget`, keeping >= 2
    grid steps when n >= 2 (so both v7x TensorCores get work)."""
    best = 0
    for nb in range(1, n + 1):
        if n % nb:
            continue
        if n >= 2 and (n // nb) < 2:
            continue
        # in + out, double-buffered, plus f32 working headroom for the block.
        need = nb * (4 * elem_io_bytes + 2 * elem_f32_bytes)
        if need <= budget:
            best = nb
    return best


def _pick_hw_tile(hw_pad, c, itemsize, cap_bytes):
    """Largest multiple of 128 that divides hw_pad and keeps C*tile under cap."""
    cap_bytes = max(cap_bytes, c * 128 * itemsize)
    best = 128
    t = 128
    while t <= hw_pad:
        if hw_pad % t == 0 and c * t * itemsize <= cap_bytes:
            best = t
        t += 128
    return best


# ---------------------------------------------------------------------------
# Forward pass
# ---------------------------------------------------------------------------
def channel_att_forward(x_nchw, conv_weight, *, force_two_pass=False, hw_tile=None):
    """Forward pass of channel_att.

    x_nchw      : (N, C, H, W) activations (f32 or bf16)
    conv_weight : (1, 1, k)    f32 PyTorch Conv1d weight (bias=False, k odd)
    returns     : (N, C, H, W) same dtype as x_nchw
    """
    N, C, H, W = x_nchw.shape
    assert conv_weight.ndim == 3 and conv_weight.shape[:2] == (1, 1)
    k = conv_weight.shape[-1]
    assert k % 2 == 1, "channel_att always produces an odd kernel size"
    pad = (k - 1) // 2
    HW = H * W
    HW_pad = _round_up(HW, 128)          # keep the lane axis dense
    itemsize = jnp.dtype(x_nchw.dtype).itemsize
    inv_hw = 1.0 / float(HW)             # true mean even with zero spatial padding

    # Free reshape; pad spatial up to a multiple of 128 only if needed.
    x3 = x_nchw.reshape(N, C, HW)
    if HW_pad != HW:
        x3 = jnp.pad(x3, ((0, 0), (0, 0), (0, HW_pad - HW)))

    w = conv_weight.reshape(k).astype(jnp.float32)

    cap = _vmem_capacity_bytes()
    budget = int(cap * 0.6)
    vmem_limit = max(32 * 1024 * 1024,
                     min(int(cap * 0.75), 100 * 1024 * 1024))

    elem_io = C * HW_pad * itemsize
    elem_f32 = C * HW_pad * 4
    nb = 0 if force_two_pass else _pick_batch_block(N, elem_io, elem_f32, budget)

    if nb:
        # ---- Fused single-pass kernel: x read from HBM exactly once. --------
        kernel = functools.partial(_fused_kernel, k=k, pad=pad, inv_hw=inv_hw)
        cost = pl.CostEstimate(
            flops=2 * N * C * HW_pad + 4 * k * N * C,
            transcendentals=N * C,
            bytes_accessed=2 * N * C * HW_pad * itemsize + 4 * k,
        )
        out3 = pl.pallas_call(
            kernel,
            out_shape=jax.ShapeDtypeStruct((N, C, HW_pad), x_nchw.dtype),
            grid_spec=pltpu.PrefetchScalarGridSpec(
                num_scalar_prefetch=0,
                grid=(N // nb,),
                in_specs=[
                    pl.BlockSpec(memory_space=pltpu.MemorySpace.SMEM),    # weights
                    pl.BlockSpec((nb, C, HW_pad), lambda n: (n, 0, 0)),   # x
                ],
                out_specs=pl.BlockSpec((nb, C, HW_pad), lambda n: (n, 0, 0)),
            ),
            compiler_params=pltpu.CompilerParams(
                dimension_semantics=("parallel",),
                vmem_limit_bytes=vmem_limit,
            ),
            cost_estimate=cost,
        )(w, x3)
    else:
        # ---- Spatially-tiled two-pass fallback (slab too big for VMEM). -----
        if hw_tile is None:
            hw_tile = _pick_hw_tile(HW_pad, C, itemsize, budget // 8)
        assert HW_pad % hw_tile == 0 and hw_tile % 128 == 0
        n_hw = HW_pad // hw_tile

        # Pass 1: pooled spatial mean, accumulated over HW tiles (axis last).
        pooled3 = pl.pallas_call(
            functools.partial(_pool_kernel, inv_hw=inv_hw),
            out_shape=jax.ShapeDtypeStruct((N, C, 1), jnp.float32),
            grid_spec=pltpu.PrefetchScalarGridSpec(
                num_scalar_prefetch=0,
                grid=(N, n_hw),
                in_specs=[pl.BlockSpec((1, C, hw_tile), lambda n, h: (n, 0, h))],
                out_specs=pl.BlockSpec((1, C, 1), lambda n, h: (n, 0, 0)),
            ),
            compiler_params=pltpu.CompilerParams(
                dimension_semantics=("parallel", "arbitrary"),
                vmem_limit_bytes=vmem_limit,
            ),
        )(x3)

        # Tiny channel conv + sigmoid on (N, C) in plain JAX.
        pooled = pooled3[:, :, 0]
        pp = jnp.pad(pooled, ((0, 0), (pad, pad)))
        att = jnp.zeros_like(pooled)
        for j in range(k):
            att = att + w[j] * pp[:, j:j + C]
        gate3 = jax.nn.sigmoid(att)[:, :, None]               # (N, C, 1) f32

        # Pass 2: gating, tiled over (batch, HW tiles).
        cost = pl.CostEstimate(
            flops=N * C * HW_pad,
            transcendentals=0,
            bytes_accessed=2 * N * C * HW_pad * itemsize,
        )
        out3 = pl.pallas_call(
            _gate_mul_kernel,
            out_shape=jax.ShapeDtypeStruct((N, C, HW_pad), x_nchw.dtype),
            grid_spec=pltpu.PrefetchScalarGridSpec(
                num_scalar_prefetch=0,
                grid=(N, n_hw),
                in_specs=[
                    pl.BlockSpec((1, C, 1), lambda n, h: (n, 0, 0)),       # gate
                    pl.BlockSpec((1, C, hw_tile), lambda n, h: (n, 0, h)),  # x
                ],
                out_specs=pl.BlockSpec((1, C, hw_tile), lambda n, h: (n, 0, h)),
            ),
            compiler_params=pltpu.CompilerParams(
                dimension_semantics=("parallel", "parallel"),
                vmem_limit_bytes=vmem_limit,
            ),
            cost_estimate=cost,
        )(gate3, x3)

    if HW_pad != HW:
        out3 = out3[:, :, :HW]
    return out3.reshape(N, C, H, W)


# ---------------------------------------------------------------------------
# Pure-JAX reference (matches PyTorch channel_att.forward)
# ---------------------------------------------------------------------------
def _reference(x, conv_weight):
    N, C, H, W = x.shape
    k = conv_weight.shape[-1]
    pad = (k - 1) // 2
    pooled = jnp.mean(x, axis=(2, 3))                              # (N, C)
    pp = jnp.pad(pooled, ((0, 0), (pad, pad)))
    att = jnp.zeros((N, C), jnp.float32)
    for j in range(k):
        att = att + conv_weight[0, 0, j] * pp[:, j:j + C]
    gate = jax.nn.sigmoid(att)
    return x * gate[:, :, None, None]


if __name__ == "__main__":
    # channel_att(channel=64, b=1, gamma=2)  ->  kernel_size = 3
    N, C, H, W = 2, 64, 16, 16
    b, gamma_ = 1, 2
    k = int(abs((math.log2(C) + b) / gamma_))
    k = k if k % 2 else k + 1

    key = jax.random.PRNGKey(0)
    kx, kw = jax.random.split(key)
    x = jax.random.normal(kx, (N, C, H, W), dtype=jnp.float32)
    conv_weight = jax.random.normal(kw, (1, 1, k), dtype=jnp.float32) * 0.5

    ref = _reference(x, conv_weight)

    # Fused single-pass path.
    out = jax.block_until_ready(channel_att_forward(x, conv_weight))
    assert out.shape == (N, C, H, W), out.shape
    err = float(jnp.max(jnp.abs(out - ref)))
    assert jnp.allclose(out, ref, atol=1e-5, rtol=1e-5), err

    # Exercise the spatially-tiled two-pass fallback as well.
    out2 = jax.block_until_ready(
        channel_att_forward(x, conv_weight, force_two_pass=True, hw_tile=128))
    err2 = float(jnp.max(jnp.abs(out2 - ref)))
    assert jnp.allclose(out2, ref, atol=1e-5, rtol=1e-5), err2

    print("KERNEL_OK")
</pallas_src>

<mosaic_0001>
module attributes {stable_mosaic.version = 11 : i64} {
  func.func @_fused_kernel(%arg0: i32, %arg1: memref<3xf32, #tpu.memory_space<smem>>, %arg2: memref<1x64x256xf32, #tpu.memory_space<vmem>>, %arg3: memref<1x64x256xf32, #tpu.memory_space<vmem>>) attributes {dimension_semantics = [#tpu.dimension_semantics<parallel>], iteration_bounds = array<i64: 2>, scalar_prefetch = 0 : i64, scratch_operands = 0 : i64, tpu.core_type = #tpu.core_type<tc>, window_params = [{transform_indices = @transform_0, window_bounds = array<i64: 3>}, {transform_indices = @transform_1, window_bounds = array<i64: 1, 64, 256>}, {transform_indices = @transform_2, window_bounds = array<i64: 1, 64, 256>}]} {
    %c0 = arith.constant 0 : index
    %c0_0 = arith.constant 0 : index
    %c0_1 = arith.constant 0 : index
    %0 = vector.load %arg2[%c0, %c0_0, %c0_1] : memref<1x64x256xf32, #tpu.memory_space<vmem>>, vector<1x64x256xf32>
    %cst = arith.constant dense<0.000000e+00> : vector<1x64xf32>
    %1 = vector.multi_reduction <add>, %0, %cst [2] : vector<1x64x256xf32> to vector<1x64xf32>
    %cst_2 = arith.constant 3.906250e-03 : f32
    %2 = vector.broadcast %cst_2 : f32 to vector<1x64xf32>
    %3 = arith.mulf %1, %2 : vector<1x64xf32>
    %4 = tpu.iota {dimensions = array<i32: 1>} : vector<1x64xi32>
    %cst_3 = arith.constant 0.000000e+00 : f32
    %5 = vector.broadcast %cst_3 : f32 to vector<1x64xf32>
    %c1_i32 = arith.constant 1 : i32
    %6 = tpu.dynamic_rotate %3 by %c1_i32 dim 1 : vector<1x64xf32>, i32 -> vector<1x64xf32>
    %c-1_i32 = arith.constant -1 : i32
    %7 = vector.broadcast %c-1_i32 : i32 to vector<1x64xi32>
    %8 = arith.addi %4, %7 : vector<1x64xi32>
    %c0_i32 = arith.constant 0 : i32
    %9 = vector.broadcast %c0_i32 : i32 to vector<1x64xi32>
    %10 = arith.cmpi sge, %8, %9 : vector<1x64xi32>
    %c-1_i32_4 = arith.constant -1 : i32
    %11 = vector.broadcast %c-1_i32_4 : i32 to vector<1x64xi32>
    %12 = arith.addi %4, %11 : vector<1x64xi32>
    %c64_i32 = arith.constant 64 : i32
    %13 = vector.broadcast %c64_i32 : i32 to vector<1x64xi32>
    %14 = arith.cmpi slt, %12, %13 : vector<1x64xi32>
    %15 = arith.andi %10, %14 : vector<1x64xi1>
    %cst_5 = arith.constant 0.000000e+00 : f32
    %16 = vector.broadcast %cst_5 : f32 to vector<1x64xf32>
    %17 = arith.select %15, %6, %16 : vector<1x64xi1>, vector<1x64xf32>
    %c0_6 = arith.constant 0 : index
    %18 = memref.load %arg1[%c0_6] : memref<3xf32, #tpu.memory_space<smem>>
    %19 = vector.broadcast %18 : f32 to vector<1x64xf32>
    %20 = arith.mulf %19, %17 : vector<1x64xf32>
    %21 = arith.addf %5, %20 : vector<1x64xf32>
    %c1 = arith.constant 1 : index
    %22 = memref.load %arg1[%c1] : memref<3xf32, #tpu.memory_space<smem>>
    %23 = vector.broadcast %22 : f32 to vector<1x64xf32>
    %24 = arith.mulf %23, %3 : vector<1x64xf32>
    %25 = arith.addf %21, %24 : vector<1x64xf32>
    %c63_i32 = arith.constant 63 : i32
    %26 = tpu.dynamic_rotate %3 by %c63_i32 dim 1 : vector<1x64xf32>, i32 -> vector<1x64xf32>
    %c1_i32_7 = arith.constant 1 : i32
    %27 = vector.broadcast %c1_i32_7 : i32 to vector<1x64xi32>
    %28 = arith.addi %4, %27 : vector<1x64xi32>
    %c0_i32_8 = arith.constant 0 : i32
    %29 = vector.broadcast %c0_i32_8 : i32 to vector<1x64xi32>
    %30 = arith.cmpi sge, %28, %29 : vector<1x64xi32>
    %c1_i32_9 = arith.constant 1 : i32
    %31 = vector.broadcast %c1_i32_9 : i32 to vector<1x64xi32>
    %32 = arith.addi %4, %31 : vector<1x64xi32>
    %c64_i32_10 = arith.constant 64 : i32
    %33 = vector.broadcast %c64_i32_10 : i32 to vector<1x64xi32>
    %34 = arith.cmpi slt, %32, %33 : vector<1x64xi32>
    %35 = arith.andi %30, %34 : vector<1x64xi1>
    %cst_11 = arith.constant 0.000000e+00 : f32
    %36 = vector.broadcast %cst_11 : f32 to vector<1x64xf32>
    %37 = arith.select %35, %26, %36 : vector<1x64xi1>, vector<1x64xf32>
    %c2 = arith.constant 2 : index
    %38 = memref.load %arg1[%c2] : memref<3xf32, #tpu.memory_space<smem>>
    %39 = vector.broadcast %38 : f32 to vector<1x64xf32>
    %40 = arith.mulf %39, %37 : vector<1x64xf32>
    %41 = arith.addf %25, %40 : vector<1x64xf32>
    %42 = arith.negf %41 : vector<1x64xf32>
    %43 = math.exp %42 : vector<1x64xf32>
    %cst_12 = arith.constant 1.000000e+00 : f32
    %44 = vector.broadcast %cst_12 : f32 to vector<1x64xf32>
    %45 = arith.addf %44, %43 : vector<1x64xf32>
    %46 = arith.divf %44, %45 : vector<1x64xf32>
    %47 = vector.shape_cast %46 : vector<1x64xf32> to vector<1x64x1xf32>
    %48 = vector.broadcast %47 : vector<1x64x1xf32> to vector<1x64x256xf32>
    %49 = arith.mulf %0, %48 : vector<1x64x256xf32>
    %c0_13 = arith.constant 0 : index
    %c0_14 = arith.constant 0 : index
    %c0_15 = arith.constant 0 : index
    %50 = vector.load %arg3[%c0_13, %c0_14, %c0_15] : memref<1x64x256xf32, #tpu.memory_space<vmem>>, vector<1x64x256xf32>
    tpu.vector_store %arg3[%c0_13, %c0_14, %c0_15], %49 {strides = array<i32>} : memref<1x64x256xf32, #tpu.memory_space<vmem>>, vector<1x64x256xf32>,
    return
  }
  func.func @transform_0(%arg0: i32) -> i32 {
    %c0_i32 = arith.constant 0 : i32
    %c0_i32_0 = arith.constant 0 : i32
    return %c0_i32 : i32
  }
  func.func @transform_1(%arg0: i32) -> (i32, i32, i32) {
    %c0_i32 = arith.constant 0 : i32
    %c0_i32_0 = arith.constant 0 : i32
    %c0_i32_1 = arith.constant 0 : i32
    return %arg0, %c0_i32, %c0_i32_0 : i32, i32, i32
  }
  func.func @transform_2(%arg0: i32) -> (i32, i32, i32) {
    %c0_i32 = arith.constant 0 : i32
    %c0_i32_0 = arith.constant 0 : i32
    %c0_i32_1 = arith.constant 0 : i32
    return %arg0, %c0_i32, %c0_i32_0 : i32, i32, i32
  }
}

</mosaic_0001>

<bundles_post_ra>
// kernel: tpu_custom_call.1
= control target key start
LH: loop header
LB: loop body
LE: loop exit
PB: predicated region body
PF: predicated region fallthrough
CT: control target
= control target key end

     0   :  { %7 = vsyncpa [#allocation5], 0  ;;  %s1042_s0 = inlined_call_operand.hbm [shape: f32[3], index: 0, kind: input, shape index: {}]   ;;  %s1043_s1 = inlined_call_operand.hbm [shape: f32[2,64,256], index: 1, kind: input, shape index: {}]   ;;  %s1044_s2 = inlined_call_operand.hbm [shape: f32[2,64,256], index: 2, kind: output, shape index: {}]  }
   0x1   :  { %8 = vsyncpa [#allocation3], 0 }
   0x2   :  { %10 = vsyncpa [#allocation3 + $0x1], 0 }
   0x3   :  { %11 = vsyncpa [#allocation4], 0 }
   0x4   :  { %13 = vsyncpa [#allocation4 + $0x1], 0  ;;  %s772_s9 = smov 0   ;;  %s774_s10 = smov 0  }
   0x5   :  { %s776_s11 = smov 0   ;;  %s778_s12 = smov 0  }
   0x6 LB: > { %s793_s13 = sadd.s32 4294967295, %s747_s12   ;;  %s534_s14 = sadd.s32 4294967294, %s747_s12   ;;  %s747_s12 = sphi %s778_s12, %s1055_s12   ;;  %s743_s11 = sphi %s776_s11, %s1054_s11   ;;  %s739_s10 = sphi %s774_s10, %s1053_s10   ;;  %s735_s9 = sphi %s772_s9, %s1052_s9  }
   0x7   : > { %s797_s15 = sadd.s32 1, %s747_s12   ;;  %s47_s16 = sadd.s32 1, %s743_s11 }
   0x8   : > { %s44_s17 = ssub.s32 %s747_s12, %s797_s15  ;;  %p54_p0 = scmp.ne.s32.totalorder %s743_s11, %s739_s10 }
   0x9   : > { %p45_p1 = scmp.eq.s32.totalorder %s44_s17, 0  ;;  %p55_p2 = scmp.eq.s32.totalorder %s747_s12, 0 }
   0xa   : > { %p60_p3 = scmp.ne.s32.totalorder %s739_s10, %s735_s9  ;;  %p61_p4 = scmp.eq.s32.totalorder %s793_s13, 0 }
   0xb   : > { %s809_s18 = scalar_select %p45_p1, %s743_s11, %s47_s16  }
   0xc   : > { %p811_p5 = por %p55_p2, %p54_p0  ;;  %p817_p6 = por %p61_p4, %p60_p3 }
   0xd   : > { %p84_p7 = scmp.eq.s32.totalorder %s793_s13, 1  ;;  %p90_p8 = scmp.eq.s32.totalorder %s534_s14, 1 }
   0xe   : > { %p535_p9 = scmp.ge.s32.totalorder %s747_s12, 1  ;;  %p97_p10 = scmp.lt.s32.totalorder %s747_s12, 3 }
   0xf   : > { %p824_p11 = por %p84_p7, %p54_p0  ;;  %p828_p12 = por %p90_p8, %p60_p3 }
  0x10   : > { %p832_p13 = pnand %p535_p9, %p97_p10  ;;  %s109_s26 = sshll.u32 %s1042_s0, 4  ;;  %s110_s26 = int_to_ptr.hbm [resolvable:$true] %s109_s26 }
  0x11   : > { %p576_p2 = scmp.lt.s32.totalorder %s747_s12, 2  ;;  %s120_s27 = sand.u32 1, %s743_s11  }
  0x12   : > { %p563_p1 = pneg %p832_p13  ;;  %s538_s29 = sshll.u32 %s120_s27, 7 }
  0x13   : > { %p848_p3 = pnand %p576_p2, %p811_p5  ;;  %s749_s30 = smov [#allocation2]  }
  0x14   : > { %p564_p7 = pnand %p563_p1, %p61_p4  ;;  %s553_s3 = sshll.u32 %s747_s12, 7 }
  0x15   : > { %s124_s4 = scalar_lea.vmem [#allocation6], %s538_s29  ;;  %s129_s8 = scalar_lea.hbm %s1043_s1, %s553_s3 }
  0x16   : > { %566 = dma.hbm_to_smem (!%p564_p7), %s110_s26, 16, %s749_s30, [#allocation5]  }
  0x17   : > { %s132_s5 = sshll.u32 %s124_s4, 4  ;;  %s130_s14 = sshll.u32 %s129_s8, 4  ;;  %s133_s5 = int_to_ptr.vmem [resolvable:$true] %s132_s5  ;;  %s131_s14 = int_to_ptr.hbm [resolvable:$true] %s130_s14 }
  0x18   : > { %s121_s16 = scalar_lea.sflag [#allocation3], %s120_s27  ;;  %s647_s17 = sshra.s32 %s131_s14, 4  ;;  %s648_s17 = int_to_ptr.hbm [resolvable:$true] %s647_s17 }
  0x19   : > { %s649_s19 = scalar_lea.hbm %s648_s17, 128  ;;  %p651_p8 = pneg %p848_p3 }
  0x1a   : > { %p650_p5 = scmp.ne.s32.totalorder %s648_s17, %s649_s19  ;;  %s654_s26 = scalar_lea.hbm %s1043_s1, 256 }
  0x1b   : > { %p655_p1 = scmp.lt.s32.totalorder %s648_s17, %s1043_s1  ;;  %p656_p2 = scmp.lt.s32.totalorder %s654_s26, %s649_s19 }
  0x1c   : > { %p652_p9 = pnand %p651_p8, %p650_p5 }
  0x1d   : > { %p657_p7 = por %p656_p2, %p655_p1 }
  0x1e   : > { %p653_p10 = pneg %p652_p9 }
  0x20   : > { %p658_p0 = pnand %p657_p7, %p653_p10 }
  0x22   : > { %661 = shalt.err (!%p658_p0)
}
  0x23   : > { %s750_s27 = smov 256   ;;  %s751_s3 = smov 16  }
  0x24   : > { %570 = dma.hbm_to_vmem [thread:$0]  (!%p848_p3), %s131_s14, 2048, %s133_s5, %s121_s16, %s750_s27, %s750_s27, %s751_s3  }
  0x25   : > { %144 = sbr.rel (%p832_p13) target bundleno = 704 (0x2c0), region = 28 }
  0x2a   : > { %722 = dma.done.wait (%p61_p4), [#allocation5], 16  }
  0x2b   : > { %724 = vsyncadd (%p61_p4), [#allocation5], 4294967280  ;;  %s873_s4 = sand.u32 1, %s739_s10  }
  0x2c   : > { %s543_s6 = sshll.u32 %s873_s4, 7  ;;  %s152_s7 = scalar_lea.sflag [#allocation3], %s873_s4 }
  0x2d   : > { %s879_s28 = scalar_lea.vmem [#allocation6], %s543_s6 }
  0x2e   : > { %726 = dma.done.wait (%p817_p6), %s152_s7, 2048  }
  0x2f   : > { %728 = vsyncadd (%p817_p6), %s152_s7, 4294965248 }
  0x30   : > { %161 = sfence }
  0x31   : > { %v886_v0 = vld [vmem:[%s879_s28] sm:$0xff]  ;;  %v889_v1 = vld [vmem:[%s879_s28 + $0x8] sm:$0xff]  ;;  %v910_v9 = vld [vmem:[%s879_s28 + $0x10] sm:$0xff]  ;;  %s545_s20 = sld [smem:[#allocation2 + $0x1]]  ;;  %v226_v24 = vlaneseq  ;;  %vm239_vm0 = vcmask 130112   ;;  %vm243_vm1 = vcmask 195712  }
  0x32   : > { %v892_v2 = vld [vmem:[%s879_s28 + $0x20] sm:$0xff]  ;;  %v194_v3 = vadd.f32 %v889_v1, %v886_v0  ;;  %v897_v4 = vld [vmem:[%s879_s28 + $0x28] sm:$0xff]  ;;  %v913_v10 = vld [vmem:[%s879_s28 + $0x18] sm:$0xff]  ;;  %vm247_vm2 = vcmask 261312   ;;  %vm251_vm3 = vcmask 326912   ;;  %vm255_vm4 = vcmask 392512  }
  0x33   : > { %v900_v5 = vld [vmem:[%s879_s28 + $0x40] sm:$0xff]  ;;  %v903_v6 = vld [vmem:[%s879_s28 + $0x48] sm:$0xff]  ;;  %v200_v7 = vadd.f32 %v897_v4, %v892_v2  ;;  %v916_v11 = vld [vmem:[%s879_s28 + $0x30] sm:$0xff]  ;;  %v197_v15 = vadd.f32 %v913_v10, %v910_v9  ;;  %v950_v25 = vand.u32 127, %v226_v24  ;;  %vm259_vm5 = vcmask 458112   ;;  %s752_s23 = smov 64  }
  0x34   : > { %v206_v8 = vadd.f32 %v903_v6, %v900_v5  ;;  %195 = vadd.xlane.f32.xlu0 %v194_v3  ;;  %v919_v12 = vld [vmem:[%s879_s28 + $0x38] sm:$0xff]  ;;  %v922_v13 = vld [vmem:[%s879_s28 + $0x50] sm:$0xff]  ;;  %v934_v18 = vld [vmem:[%s879_s28 + $0x60] sm:$0xff]  ;;  %vm263_vm6 = vcmask 523712   ;;  %vm266_vm7 = vcmask 1048064   ;;  %s753_s5 = smov 127  }
  0x35   : > { %201 = vadd.xlane.f32.xlu1 %v200_v7  ;;  %v925_v14 = vld [vmem:[%s879_s28 + $0x58] sm:$0xff]  ;;  %v203_v16 = vadd.f32 %v919_v12, %v916_v11  ;;  %v937_v19 = vld [vmem:[%s879_s28 + $0x68] sm:$0xff]  ;;  %v940_v20 = vld [vmem:[%s879_s28 + $0x70] sm:$0xff]  ;;  %v241_v32 = vadd.s32 4294967280, %v950_v25  ;;  %v249_v34 = vadd.s32 4294967264, %v950_v25  ;;  %v237_v39 = vadd.s32 4294967288, %v950_v25 }
  0x36   : > { %207 = vadd.xlane.f32.xlu2 %v206_v8  ;;  %v209_v17 = vadd.f32 %v925_v14, %v922_v13  ;;  %v943_v21 = vld [vmem:[%s879_s28 + $0x78] sm:$0xff]  ;;  %v212_v22 = vadd.f32 %v937_v19, %v934_v18  ;;  %v245_v41 = vadd.s32 4294967272, %v950_v25  ;;  %v253_v47 = vadd.s32 4294967256, %v950_v25  ;;  %s754_s8 = smov 65   ;;  %s282_s14 = sld [smem:[#allocation2]] }
  0x37   : > { %v215_v23 = vadd.f32 %v943_v21, %v940_v20  ;;  %v287_v27 = vstv %s545_s20  ;;  %v257_v7 = vadd.s32 4294967248, %v950_v25  ;;  %s546_s16 = sld [smem:[#allocation2 + $0x2]]  ;;  %s976_s17 = scalar_lea.vmem [#allocation7], %s543_s6 }
  0x38   : > { %s554_s19 = sshll.u32 %s793_s13, 7  ;;  %s446_s29 = sshll.u32 %s976_s17, 4  ;;  %s447_s29 = int_to_ptr.vmem [resolvable:$true] %s446_s29 }
  0x39   : > { %s445_s26 = scalar_lea.hbm %s1044_s2, %s554_s19  ;;  %s434_s27 = scalar_lea.sflag [#allocation4], %s873_s4 }
  0x3a   : > { %s448_s30 = sshll.u32 %s445_s26, 4  ;;  %s697_s28 = scalar_lea.hbm %s1044_s2, 256  ;;  %s449_s30 = int_to_ptr.hbm [resolvable:$true] %s448_s30 }
  0x3b   : > { %s691_s3 = sshra.s32 %s449_s30, 4  ;;  %s692_s3 = int_to_ptr.hbm [resolvable:$true] %s691_s3 }
  0x3c   : > { %198 = vadd.xlane.f32.xlu0 %v197_v15  ;;  %s693_s13 = scalar_lea.hbm %s692_s3, 128  ;;  %p698_p0 = scmp.lt.s32.totalorder %s692_s3, %s1044_s2 }
  0x3d   : > { %204 = vadd.xlane.f32.xlu1 %v203_v16  ;;  %p694_p4 = scmp.ne.s32.totalorder %s692_s3, %s693_s13  ;;  %p699_p3 = scmp.lt.s32.totalorder %s697_s28, %s693_s13 }
  0x3e   : > { %210 = vadd.xlane.f32.xlu2 %v209_v17  ;;  %v261_v17 = vadd.s32 4294967240, %v950_v25 }
  0x3f   : > { %p695_p6 = pnand %p694_p4, %p824_p11  ;;  %p700_p5 = por %p699_p3, %p698_p0 }
  0x41   : > { %p696_p13 = pneg %p695_p6 }
  0x43   : > { %p701_p8 = pnand %p700_p5, %p696_p13 }
  0x44   : > { %213 = vadd.xlane.f32.xlu0 %v212_v22 }
  0x45   : > { %216 = vadd.xlane.f32.xlu1 %v215_v23 }
  0xa7   : > { %v196_v26 = vpop.xlane.xlu0 %195 }
  0xa8   : > { %v202_v28 = vpop.xlane.xlu1 %201  ;;  %v218_v36 = vmul.f32 0.00390625, %v196_v26 }
  0xa9   : > { %v208_v29 = vpop.xlane.xlu2 %207  ;;  %v220_v30 = vmul.f32 0.00390625, %v202_v28 }
  0xaa   : > { %v222_v31 = vmul.f32 0.00390625, %v208_v29  ;;  %v288_v42 = vmul.f32 %v287_v27, %v218_v36  ;;  %v236_v49 = vperm.slane %v218_v36, %v950_v25 }
  0xab   : > { %v290_v33 = vmul.f32 %v287_v27, %v220_v30  ;;  %v242_v52 = vperm.slane %v220_v30, %v241_v32 }
  0xac   : > { %v292_v35 = vmul.f32 %v287_v27, %v222_v31  ;;  %v304_v56 = vperm.slane %v288_v42, %v950_v25  ;;  %v250_v62 = vperm.slane %v222_v31, %v249_v34 }
  0xad   : > { %v307_v37 = vperm.slane %v290_v33, %v241_v32 }
  0xae   : > { %v311_v38 = vperm.slane %v292_v35, %v249_v34 }
  0xaf   : > { %v199_v40 = vpop.xlane.xlu0 %198 }
  0xb0   : > { %v219_v43 = vmul.f32 0.00390625, %v199_v40  ;;  %v205_v44 = vpop.xlane.xlu1 %204 }
  0xb1   : > { %v211_v45 = vpop.xlane.xlu2 %210  ;;  %v221_v46 = vmul.f32 0.00390625, %v205_v44 }
  0xb2   : > { %v223_v48 = vmul.f32 0.00390625, %v211_v45  ;;  %v238_v50 = vperm.slane %v219_v43, %v237_v39  ;;  %v289_v51 = vmul.f32 %v287_v27, %v219_v43 }
  0xb3   : > { %v246_v53 = vperm.slane %v221_v46, %v245_v41  ;;  %v291_v54 = vmul.f32 %v287_v27, %v221_v46 }
  0xb4   : > { %v293_v55 = vmul.f32 %v287_v27, %v223_v48  ;;  %v240_v57 = vsel %vm239_vm0, %v238_v50, %v236_v49  ;;  %v305_v58 = vperm.slane %v289_v51, %v237_v39  ;;  %v254_v15 = vperm.slane %v223_v48, %v253_v47 }
  0xb5   : > { %v244_v59 = vsel %vm243_vm1, %v242_v52, %v240_v57  ;;  %v309_v60 = vperm.slane %v291_v54, %v245_v41  ;;  %v354_v48 = vshrl.u32 %v226_v24, 7  ;;  %v283_v52 = vstv %s282_s14 }
  0xb6   : > { %v313_v61 = vperm.slane %v293_v55, %v253_v47  ;;  %v306_v63 = vsel %vm239_vm0, %v305_v58, %v304_v56  ;;  %v248_v3 = vsel %vm247_vm2, %v246_v53, %v244_v59  ;;  %v321_v47 = vadd.s32 1, %v950_v25 }
  0xb7   : > { %v308_v8 = vsel %vm243_vm1, %v307_v37, %v306_v63  ;;  %v214_v16 = vpop.xlane.xlu0 %213  ;;  %v252_v28 = vsel %vm251_vm3, %v250_v62, %v248_v3  ;;  %619 = vset.pattern.permute.xlu0 %v354_v48  ;;  %v367_v49 = vadd.s32 16, %v354_v48  ;;  %v361_v50 = vadd.s32 8, %v354_v48 }
  0xb8   : > { %v310_v22 = vsel %vm247_vm2, %v309_v60, %v308_v8  ;;  %v224_v23 = vmul.f32 0.00390625, %v214_v16  ;;  %v217_v26 = vpop.xlane.xlu1 %216  ;;  %v256_v36 = vsel %vm255_vm4, %v254_v15, %v252_v28  ;;  %vm323_vm10 = vcmp.lt.s32.totalorder %v321_v47, 64 }
  0xb9   : > { %v225_v29 = vmul.f32 0.00390625, %v217_v26  ;;  %v312_v30 = vsel %vm251_vm3, %v311_v38, %v310_v22  ;;  %621 = vset.pattern.permute.xlu1 %v367_v49  ;;  %620 = vset.pattern.permute.xlu2 %v361_v50  ;;  %v330_v54 = vstv %s546_s16  ;;  %v379_v28 = vadd.s32 32, %v354_v48 }
  0xba   : > { %v258_v31 = vperm.slane %v224_v23, %v257_v7  ;;  %v294_v32 = vmul.f32 %v287_v27, %v224_v23  ;;  %v314_v33 = vsel %vm255_vm4, %v313_v61, %v312_v30  ;;  %v385_v30 = vadd.s32 40, %v354_v48 }
  0xbb   : > { %v262_v34 = vperm.slane %v225_v29, %v261_v17  ;;  %v295_v35 = vmul.f32 %v287_v27, %v225_v29  ;;  %v273_v27 = vadd.s32 4294967295, %v950_v25  ;;  %v373_v29 = vadd.s32 24, %v354_v48 }
  0xbc   : > { %v315_v37 = vperm.slane %v294_v32, %v257_v7  ;;  %v260_v39 = vsel %vm259_vm5, %v258_v31, %v256_v36  ;;  %v397_v31 = vadd.s32 56, %v354_v48  ;;  %v391_v32 = vadd.s32 48, %v354_v48 }
  0xbd   : > { %v317_v40 = vperm.slane %v295_v35, %v261_v17  ;;  %v264_v41 = vsel %vm263_vm6, %v262_v34, %v260_v39  ;;  %vm274_vm8 = vcmp.ge.s32.totalorder %v273_v27, 0  ;;  %vm275_vm9 = vcmp.lt.s32.totalorder %v273_v27, 64 }
  0xbe   : > { %267 = vrot.lane.b32.xlu2 %v264_v41, %s752_s23  ;;  %v316_v42 = vsel %vm259_vm5, %v315_v37, %v314_v33  ;;  %vm276_vm11 = vmand %vm274_vm8, %vm275_vm9 }
  0xbf   : > { %v318_v43 = vsel %vm263_vm6, %v317_v40, %v316_v42 }
 0x118   : > { %v268_v44 = vpop.permute.xlu2 %267 }
 0x119   : > { %v269_v45 = vsel %vm266_vm7, %v268_v44, %v264_v41 }
 0x11a   : > { %270 = vrot.lane.b32.xlu0 %v269_v45, %s752_s23 }
 0x18c   : > { %v271_v38 = vpop.permute.xlu0 %270 }
 0x18d   : > { %v272_v46 = vsel %vm266_vm7, %v271_v38, %v264_v41 }
 0x18e   : > { %325 = vrot.lane.b32.xlu2 %v272_v46, %s753_s5  ;;  %278 = vrot.lane.b32.xlu1 %v272_v46, %s754_s8 }
 0x1e8   : > { %v326_v51 = vpop.permute.xlu2 %325 }
 0x1e9   : > { %v328_v55 = vsel %vm323_vm10, %v326_v51, 0.0 }
 0x1ea   : > { %v331_v58 = vmul.f32 %v330_v54, %v328_v55 }
 0x200   : > { %v279_v53 = vpop.permute.xlu1 %278 }
 0x201   : > { %v281_v56 = vsel %vm276_vm11, %v279_v53, 0.0 }
 0x202   : > { %v284_v57 = vmul.f32 %v283_v52, %v281_v56 }
 0x204   : > { %v320_v25 = vadd.f32 %v318_v43, %v284_v57 }
 0x206   : > { %v332_v59 = vadd.f32 %v331_v58, %v320_v25 }
 0x208   : > { %v547_v24 = vmul.f32 -1.442695, %v332_v59 }
 0x20a   : > { %628 = vpow2.f32 %v547_v24 }
 0x210   : > { %v629_v60 = vpop.eup %628 }
 0x211   : > { %v336_v61 = vadd.f32 1.0, %v629_v60 }
 0x213   : > { %630 = vrcp.f32 %v336_v61  ;;  %v348_v7 = vand.u32 2147483648, %v336_v61  ;;  %v346_v15 = vand.u32 2147483647, %v336_v61  ;;  %vm342_vm13 = vweird.f32 %v336_v61 }
 0x215   : > { %v349_v17 = vor.u32 1.1754944e-38, %v348_v7  ;;  %vm347_vm15 = vcmp.eq.f32.partialorder %v346_v15, 8.507059e+37 }
 0x219   : > { %v631_v62 = vpop.eup %630 }
 0x21a   : > { %v338_v63 = vmul.f32 %v631_v62, %v336_v61  ;;  %vm343_vm12 = vweird.f32 %v631_v62 }
 0x21b   : > { %vm344_vm14 = vmor %vm342_vm13, %vm343_vm12 }
 0x21c   : > { %v339_v3 = vsub.f32 1.0, %v338_v63 }
 0x21e   : > { %v340_v8 = vmul.f32 %v631_v62, %v339_v3 }
 0x220   : > { %v341_v16 = vadd.f32 %v631_v62, %v340_v8 }
 0x222   : > { %v345_v22 = vsel %vm344_vm14, %v631_v62, %v341_v16 }
 0x223   : > { %v350_v23 = vsel %vm347_vm15, %v349_v17, %v345_v22 }
 0x224   : > { %v352_v26 = vperm.slane %v350_v23, 0 }
 0x226   : > { %369 = vperm.xlu1 %621, %v352_v26   ;;  %363 = vperm.xlu2 %620, %v352_v26  }
 0x227   : > { %357 = vperm.xlu0 %619, %v352_v26  }
 0x22e   : > { %623 = vset.pattern.permute.xlu1 %v379_v28  ;;  %622 = vset.pattern.permute.xlu2 %v373_v29 }
 0x22f   : > { %624 = vset.pattern.permute.xlu0 %v385_v30 }
 0x236   : > { %381 = vperm.xlu1 %623, %v352_v26   ;;  %375 = vperm.xlu2 %622, %v352_v26  }
 0x237   : > { %387 = vperm.xlu0 %624, %v352_v26  }
 0x23e   : > { %626 = vset.pattern.permute.xlu1 %v397_v31  ;;  %625 = vset.pattern.permute.xlu2 %v391_v32 }
 0x23f   : > { %627 = vset.pattern.permute.xlu0 %v397_v31 }
 0x246   : > { %399 = vperm.xlu1 %626, %v352_v26   ;;  %393 = vperm.xlu2 %625, %v352_v26  }
 0x280   : > { %v364_v33 = vpop.permute.xlu2 %363 }
 0x281   : > { %v403_v34 = vmul.f32 %v364_v33, %v910_v9  ;;  %v404_v35 = vmul.f32 %v364_v33, %v913_v10 }
 0x283   : > { %419 = vst [vmem:[%s976_s17 + $0x10] sm:$0xff] %v403_v34 }
 0x284   : > { %420 = vst [vmem:[%s976_s17 + $0x18] sm:$0xff] %v404_v35 }
 0x290   : > { %v376_v36 = vpop.permute.xlu2 %375 }
 0x291   : > { %v407_v37 = vmul.f32 %v376_v36, %v916_v11  ;;  %v408_v9 = vmul.f32 %v376_v36, %v919_v12 }
 0x293   : > { %423 = vst [vmem:[%s976_s17 + $0x30] sm:$0xff] %v407_v37 }
 0x294   : > { %424 = vst [vmem:[%s976_s17 + $0x38] sm:$0xff] %v408_v9 }
 0x298   : > { %v370_v10 = vpop.permute.xlu1 %369 }
 0x299   : > { %v405_v39 = vmul.f32 %v370_v10, %v892_v2  ;;  %v406_v40 = vmul.f32 %v370_v10, %v897_v4  ;;  %v358_v41 = vpop.permute.xlu0 %357 }
 0x29a   : > { %v401_v42 = vmul.f32 %v358_v41, %v886_v0  ;;  %v402_v43 = vmul.f32 %v358_v41, %v889_v1 }
 0x29b   : > { %421 = vst [vmem:[%s976_s17 + $0x20] sm:$0xff] %v405_v39 }
 0x29c   : > { %422 = vst [vmem:[%s976_s17 + $0x28] sm:$0xff] %v406_v40 }
 0x29d   : > { %417 = vst [vmem:[%s976_s17] sm:$0xff] %v401_v42 }
 0x29e   : > { %418 = vst [vmem:[%s976_s17 + $0x8] sm:$0xff] %v402_v43 }
 0x2a0   : > { %v394_v11 = vpop.permute.xlu2 %393 }
 0x2a1   : > { %v413_v12 = vmul.f32 %v394_v11, %v934_v18  ;;  %v414_v2 = vmul.f32 %v394_v11, %v937_v19 }
 0x2a3   : > { %429 = vst [vmem:[%s976_s17 + $0x60] sm:$0xff] %v413_v12 }
 0x2a4   : > { %430 = vst [vmem:[%s976_s17 + $0x68] sm:$0xff] %v414_v2 }
 0x2a8   : > { %v382_v0 = vpop.permute.xlu1 %381 }
 0x2a9   : > { %v409_v1 = vmul.f32 %v382_v0, %v900_v5  ;;  %v410_v4 = vmul.f32 %v382_v0, %v903_v6  ;;  %v388_v44 = vpop.permute.xlu0 %387 }
 0x2aa   : > { %v411_v45 = vmul.f32 %v388_v44, %v922_v13  ;;  %v412_v38 = vmul.f32 %v388_v44, %v925_v14 }
 0x2ab   : > { %425 = vst [vmem:[%s976_s17 + $0x40] sm:$0xff] %v409_v1 }
 0x2ac   : > { %426 = vst [vmem:[%s976_s17 + $0x48] sm:$0xff] %v410_v4 }
 0x2ad   : > { %427 = vst [vmem:[%s976_s17 + $0x50] sm:$0xff] %v411_v45 }
 0x2ae   : > { %428 = vst [vmem:[%s976_s17 + $0x58] sm:$0xff] %v412_v38 }
 0x2b8   : > { %v400_v5 = vpop.permute.xlu1 %399 }
 0x2b9   : > { %v415_v6 = vmul.f32 %v400_v5, %v940_v20  ;;  %v416_v13 = vmul.f32 %v400_v5, %v943_v21 }
 0x2bb   : > { %431 = vst [vmem:[%s976_s17 + $0x70] sm:$0xff] %v415_v6 }
 0x2bc   : > { %432 = vst [vmem:[%s976_s17 + $0x78] sm:$0xff] %v416_v13 }
 0x2bd   : > { %704 = shalt.err (!%p701_p8)
}
 0x2be   : > { %s755_s4 = smov 256   ;;  %s756_s5 = smov 16  }
 0x2bf   : > { %561 = dma.vmem_to_hbm [thread:$0]  (%p824_p11), %s447_s29, 2048, %s449_s30, %s434_s27, %s755_s4, %s755_s4, %s756_s5  }
 0x2c0 PF: > { %s463_s8 = sand.u32 1, %s735_s9   ;;  %p1051_p9 = scmp.ge.s32.totalorder %s747_s12, 2 }
 0x2c1   : > { %s464_s14 = scalar_lea.sflag [#allocation4], %s463_s8 }
 0x2c2   : > { %p572_p10 = pnand %p1051_p9, %p828_p12 }
 0x2c4   : > { %p573_p1 = pneg %p572_p10 }
 0x2c6   : > { %730 = dma.done.wait (%p573_p1), %s464_s14, 2048  }
 0x2c7   : > { %732 = vsyncadd (%p573_p1), %s464_s14, 4294965248  ;;  %p16_p2 = scmp.ge.s32.totalorder %s797_s15, 4   ;;  %s1052_s9 = smov %s739_s10 }
 0x2c8   : > { %s1053_s10 = smov %s743_s11  ;;  %s1054_s11 = smov %s809_s18 }
 0x2c9   : > { %s1055_s12 = smov %s797_s15  ;;  %18 = sbr.rel (!%p16_p2) target bundleno = 6 (0x6), region = 78 }
 0x2ce   :  { %470 = vsyncpa [#allocation3], 1 }
 0x2cf   :  { %472 = vsyncpa [#allocation3 + $0x1], 1 }
 0x2d0   :  { %473 = vsyncpa [#allocation4], 1 }
 0x2d1   :  { %475 = vsyncpa [#allocation4 + $0x1], 1 }
 0x2d2   :  { %476 = vsyncpa [#allocation5], 1 }
 0x2d3   :  { %478 = vsyncpa [#allocation5 + $0x1], 1 }

</bundles_post_ra>
